<compile_context>
chip_gen: v7x
topology: tpu7x:2x2x1
jax: 0.10.0
libtpu: 0.0.40
codegen_flags: <defaults>
</compile_context>

<pallas_src>
import functools

import jax
import jax.numpy as jnp
from jax.experimental import pallas as pl
from jax.experimental.pallas import tpu as pltpu


def gala_stream_kernel(x_ref, w1_ref, b1_ref, w2_ref, s_ref, cs_ref, *,
                       hw, hw_tile, needs_mask):
    """Single streaming pass over one (batch, HW) tile of the feature map.

    x_ref  : (1, C, T)      f32  feature tile (channels on sublane, HW on lane)
    w1_ref : (Cs, C)        bf16 local conv1 weight (transposed)
    b1_ref : (Cs, 1)        f32  local conv1 bias
    w2_ref : (Cs, 1)        f32  local conv2 weight
    s_ref  : (1, 1, T)      f32  beta-independent local map S (lane-dense)
    cs_ref : (1, 1, 1, C)   f32  per-tile channel sums (for the global mean)
    """
    x = x_ref[0]                                                  # (C, T) f32

    if needs_mask:
        # Ragged last tile: zero the out-of-range lanes so the channel sums
        # stay exact (the padded part of the VMEM block is undefined).
        base = pl.program_id(1) * hw_tile
        lane = jax.lax.broadcasted_iota(jnp.int32, x.shape, 1)
        x = jnp.where(base + lane < hw, x, 0.0)

    # (a) channel sums for the global branch (exact f32, XLU reduction).
    cs_ref[0, 0, 0, :] = jnp.sum(x, axis=-1)                      # (C,)

    # (b) local attention: 1x1 conv1 on the MXU (bf16 in-register cast, f32
    # accumulation), then the tiny Cs->1 contraction on the VPU/XLU.
    xb = x.astype(jnp.bfloat16)
    l1 = jnp.dot(w1_ref[...], xb, preferred_element_type=jnp.float32)  # (Cs,T)
    l1 = jnp.maximum(l1 + b1_ref[...], 0.0)
    s = jnp.sum(l1 * w2_ref[...], axis=0, keepdims=True)          # (1, T)
    s_ref[...] = s[None]                                          # (1, 1, T)


def _pick_hw_tile(hw, c, cs, n):
    """Fixed lane-dense tile: 128..4096 lanes, multiple of 128.

    Caps: (Cs, T) f32 intermediate <= 128 KiB (no spill), f32 x tile <= 4 MiB
    (double-buffered stays well inside every generation's scoped VMEM), and at
    least 2 grid blocks when the batch axis alone can't feed v7x's 2 cores.
    """
    if hw <= 128:
        return hw                          # block == full extent (masked, tiny)
    cap_spill = max(128, ((128 * 1024) // max(1, cs * 4)) // 128 * 128)
    cap_vmem = max(128, ((4 << 20) // max(1, c * 4)) // 128 * 128)
    t = max(128, min(4096, cap_spill, cap_vmem))
    if n < 2:                              # guarantee >= 2 parallel blocks (v7x)
        t = min(t, max(128, ((hw + 1) // 2) // 128 * 128))
    t = min(t, (hw // 128) * 128)          # never exceed the array extent
    return max(128, t)


def gala_forward(x_nchw, params, hw_tile=None):
    """x_nchw: (N, C, H, W) float32.  Returns (N, 1, H, W) attention map."""
    N, C, H, W = x_nchw.shape
    HW = H * W
    Cs = params["w1l"].shape[1]

    # backbone == identity -> features = input. NCHW is already (N, C, HW)
    # after a free reshape: channels on sublane, HW on lane, no transpose.
    x = x_nchw.reshape(N, C, HW).astype(jnp.float32)

    if hw_tile is None:
        hw_tile = _pick_hw_tile(HW, C, Cs, N)
    n_tiles = pl.cdiv(HW, hw_tile)
    needs_mask = (HW % hw_tile) != 0

    # Local-branch weights in channels-on-sublane layout (tiny, VMEM-resident).
    w1l_t = params["w1l"].T.astype(jnp.bfloat16)                   # (Cs, C)
    b1l_t = params["b1l"].T.astype(jnp.float32)                    # (Cs, 1)
    w2l = params["w2l"].astype(jnp.float32)                        # (Cs, 1)

    kern = functools.partial(gala_stream_kernel, hw=HW, hw_tile=hw_tile,
                             needs_mask=needs_mask)

    tile_bytes = C * hw_tile * 4
    vmem_limit = int(min(32 << 20, max(8 << 20, 8 * tile_bytes)))
    cost = pl.CostEstimate(
        flops=2 * N * HW * Cs * C,
        transcendentals=0,
        bytes_accessed=N * HW * (4 * C + 4) + N * n_tiles * C * 4
        + (Cs * C * 2 + Cs * 8))

    s_map, cs = pl.pallas_call(
        kern,
        out_shape=(
            jax.ShapeDtypeStruct((N, 1, HW), jnp.float32),          # S map
            jax.ShapeDtypeStruct((N, n_tiles, 1, C), jnp.float32),  # chan sums
        ),
        grid_spec=pltpu.PrefetchScalarGridSpec(
            num_scalar_prefetch=0,
            grid=(N, n_tiles),
            in_specs=[
                pl.BlockSpec((1, C, hw_tile), lambda b, t: (b, 0, t)),  # x tile
                pl.BlockSpec((Cs, C), lambda b, t: (0, 0)),             # w1l^T
                pl.BlockSpec((Cs, 1), lambda b, t: (0, 0)),             # b1l
                pl.BlockSpec((Cs, 1), lambda b, t: (0, 0)),             # w2l
            ],
            out_specs=[
                pl.BlockSpec((1, 1, hw_tile), lambda b, t: (b, 0, t)),
                pl.BlockSpec((1, 1, 1, C), lambda b, t: (b, t, 0, 0)),
            ],
        ),
        compiler_params=pltpu.CompilerParams(
            dimension_semantics=("parallel", "parallel"),
            vmem_limit_bytes=vmem_limit),
        cost_estimate=cost,
    )(x, w1l_t, b1l_t, w2l)

    # ---- global branch from the kernel's per-tile channel sums (tiny) -------
    g0 = jnp.sum(cs, axis=(1, 2)) / HW                             # (N, C)
    g1 = jax.nn.relu(g0 @ params["w1g"] + params["b1g"])           # (N, Cs)
    G = g1 @ params["w2g"] + params["b2g"]                         # (N, C)

    # ---- algebraic collapse of the integrator --------------------------------
    #   A = alpha + beta * s,  s = relu(w1.x+b1).w2 (no b2l),
    #   beta = sum(wia) + G.wib,  alpha = G.wia + bint + beta*b2l
    wia = params["wia"][:, 0]                                      # (C,)
    wib = params["wib"][:, 0]                                      # (C,)
    bint = params["bint"][0, 0]
    b2l = params["b2l"][0, 0]
    beta = jnp.sum(wia) + G @ wib                                  # (N,)
    alpha = G @ wia + bint + beta * b2l                            # (N,)

    # Cheap fused FMA over the (N,1,HW) map (1/C of the streamed data).
    A = alpha[:, None, None] + beta[:, None, None] * s_map
    A = A.reshape(N, 1, H, W)

    # Bilinear interpolate back to the input spatial size (identity here since
    # the backbone is identity and the feature size == the input size).
    if (H, W) != tuple(x_nchw.shape[2:]):
        A = jax.image.resize(A, (N, 1) + tuple(x_nchw.shape[2:]), method="linear")
    return A


def gala_reference(x_nchw, p):
    """Pure-JAX f32 reference mirroring the PyTorch forward (NCHW semantics)."""
    xf = jnp.transpose(x_nchw, (0, 2, 3, 1)).astype(jnp.float32)   # (N,H,W,C)
    g0 = jnp.mean(xf, axis=(1, 2))                                 # (N,C)
    g1 = jax.nn.relu(g0 @ p["w1g"] + p["b1g"][0])
    G = g1 @ p["w2g"] + p["b2g"][0]                                # (N,C)
    l1 = jax.nn.relu(xf @ p["w1l"] + p["b1l"][0])
    S = l1 @ p["w2l"] + p["b2l"][0]                                # (N,H,W,1)
    Gb = G[:, None, None, :]                                       # (N,1,1,C)
    gps = Gb + S                                                   # (N,H,W,C)
    gts = Gb * S                                                   # (N,H,W,C)
    A = gps @ p["wia"] + gts @ p["wib"] + p["bint"][0]             # (N,H,W,1)
    return jnp.transpose(A, (0, 3, 1, 2))                          # (N,1,H,W)


def make_params(key, in_channels, shrink_factor):
    C = in_channels
    Cs = in_channels // shrink_factor
    ks = jax.random.split(key, 12)

    def u(k, shape, fan_in):
        bound = 1.0 / jnp.sqrt(fan_in)
        return jax.random.uniform(k, shape, jnp.float32, -bound, bound)

    # 1x1 convs stored as (C_in, C_out) matmul weights; biases as (1, C_out).
    params = {
        "w1g": u(ks[0], (C, Cs), C),   "b1g": u(ks[1], (1, Cs), C),
        "w2g": u(ks[2], (Cs, C), Cs),  "b2g": u(ks[3], (1, C), Cs),
        "w1l": u(ks[4], (C, Cs), C),   "b1l": u(ks[5], (1, Cs), C),
        "w2l": u(ks[6], (Cs, 1), Cs),  "b2l": u(ks[7], (1, 1), Cs),
        # integrator Conv2d(2C, 1, 1): split its weight into the halves acting
        # on (G+S) and (G*S) respectively (matches torch.cat order).
        "wia": u(ks[8], (C, 1), 2 * C),
        "wib": u(ks[9], (C, 1), 2 * C),
        "bint": u(ks[10], (1, 1), 2 * C),
    }
    return params


if __name__ == "__main__":
    N, C, H, W = 2, 32, 16, 16          # small shapes; shrink_factor = 4 -> Cs = 8
    shrink_factor = 4

    key = jax.random.PRNGKey(0)
    kx, kp = jax.random.split(key)
    x = jax.random.normal(kx, (N, C, H, W), jnp.float32)
    params = make_params(kp, C, shrink_factor)

    out = gala_forward(x, params)
    out = jax.block_until_ready(out)

    ref = gala_reference(x, params)
    assert out.shape == (N, 1, H, W), out.shape
    # Tolerance accounts for the in-kernel bf16 cast of x / the local conv1
    # weight on the MXU path (f32 accumulation); a real bug would be O(1) off.
    assert jnp.allclose(out, ref, rtol=2e-2, atol=2e-2), \
        float(jnp.max(jnp.abs(out - ref)))

    print("KERNEL_OK")
</pallas_src>

<mosaic_0001>
module attributes {stable_mosaic.version = 11 : i64} {
  func.func @gala_stream_kernel(%arg0: i32, %arg1: i32, %arg2: memref<1x32x256xf32, #tpu.memory_space<vmem>>, %arg3: memref<8x32xbf16, #tpu.memory_space<vmem>>, %arg4: memref<8x1xf32, #tpu.memory_space<vmem>>, %arg5: memref<8x1xf32, #tpu.memory_space<vmem>>, %arg6: memref<1x1x256xf32, #tpu.memory_space<vmem>>, %arg7: memref<1x1x1x32xf32, #tpu.memory_space<vmem>>) attributes {dimension_semantics = [#tpu.dimension_semantics<parallel>, #tpu.dimension_semantics<parallel>], iteration_bounds = array<i64: 2, 1>, scalar_prefetch = 0 : i64, scratch_operands = 0 : i64, tpu.core_type = #tpu.core_type<tc>, window_params = [{transform_indices = @transform_0, window_bounds = array<i64: 1, 32, 256>}, {pipeline_mode = #tpu.pipeline_mode<synchronous>, transform_indices = @transform_1, window_bounds = array<i64: 8, 32>}, {pipeline_mode = #tpu.pipeline_mode<synchronous>, transform_indices = @transform_2, window_bounds = array<i64: 8, 1>}, {pipeline_mode = #tpu.pipeline_mode<synchronous>, transform_indices = @transform_3, window_bounds = array<i64: 8, 1>}, {transform_indices = @transform_4, window_bounds = array<i64: 1, 1, 256>}, {transform_indices = @transform_5, window_bounds = array<i64: 1, 1, 1, 32>}]} {
    %c0 = arith.constant 0 : index
    %c0_0 = arith.constant 0 : index
    %c0_1 = arith.constant 0 : index
    %0 = vector.load %arg2[%c0, %c0_0, %c0_1] : memref<1x32x256xf32, #tpu.memory_space<vmem>>, vector<1x32x256xf32>
    %1 = vector.shape_cast %0 : vector<1x32x256xf32> to vector<32x256xf32>
    %cst = arith.constant dense<0.000000e+00> : vector<32xf32>
    %2 = vector.multi_reduction <add>, %1, %cst [1] : vector<32x256xf32> to vector<32xf32>
    %c0_2 = arith.constant 0 : index
    %c0_3 = arith.constant 0 : index
    %c0_4 = arith.constant 0 : index
    %c0_5 = arith.constant 0 : index
    %3 = vector.load %arg7[%c0_2, %c0_3, %c0_4, %c0_5] : memref<1x1x1x32xf32, #tpu.memory_space<vmem>>, vector<1x1x1x32xf32>
    %4 = vector.shape_cast %3 : vector<1x1x1x32xf32> to vector<32xf32>
    %5 = vector.shape_cast %2 : vector<32xf32> to vector<1x1x1x32xf32>
    tpu.vector_store %arg7[%c0_2, %c0_3, %c0_4, %c0_5], %5 {strides = array<i32>} : memref<1x1x1x32xf32, #tpu.memory_space<vmem>>, vector<1x1x1x32xf32>,
    %6 = arith.truncf %1 : vector<32x256xf32> to vector<32x256xbf16>
    %c0_6 = arith.constant 0 : index
    %c0_7 = arith.constant 0 : index
    %7 = vector.load %arg3[%c0_6, %c0_7] : memref<8x32xbf16, #tpu.memory_space<vmem>>, vector<8x32xbf16>
    %cst_8 = arith.constant dense<0.000000e+00> : vector<8x256xf32>
    %8 = tpu.matmul %7, %6, %cst_8 {dimension_numbers = #tpu.dot_dimension_numbers<[1], [0], [0], [1], [0, 0, 1, 1], [], []>} : vector<8x32xbf16>, vector<32x256xbf16>, vector<8x256xf32> -> vector<8x256xf32>
    %c0_9 = arith.constant 0 : index
    %c0_10 = arith.constant 0 : index
    %9 = vector.load %arg4[%c0_9, %c0_10] : memref<8x1xf32, #tpu.memory_space<vmem>>, vector<8x1xf32>
    %10 = vector.broadcast %9 : vector<8x1xf32> to vector<8x256xf32>
    %11 = arith.addf %8, %10 : vector<8x256xf32>
    %cst_11 = arith.constant 0.000000e+00 : f32
    %12 = vector.broadcast %cst_11 : f32 to vector<8x256xf32>
    %13 = arith.maximumf %11, %12 : vector<8x256xf32>
    %c0_12 = arith.constant 0 : index
    %c0_13 = arith.constant 0 : index
    %14 = vector.load %arg5[%c0_12, %c0_13] : memref<8x1xf32, #tpu.memory_space<vmem>>, vector<8x1xf32>
    %15 = vector.broadcast %14 : vector<8x1xf32> to vector<8x256xf32>
    %16 = arith.mulf %13, %15 : vector<8x256xf32>
    %cst_14 = arith.constant dense<0.000000e+00> : vector<256xf32>
    %17 = vector.multi_reduction <add>, %16, %cst_14 [0] : vector<8x256xf32> to vector<256xf32>
    %18 = vector.shape_cast %17 : vector<256xf32> to vector<1x256xf32>
    %19 = vector.shape_cast %18 : vector<1x256xf32> to vector<1x1x256xf32>
    %c0_15 = arith.constant 0 : index
    %c0_16 = arith.constant 0 : index
    %c0_17 = arith.constant 0 : index
    %20 = vector.load %arg6[%c0_15, %c0_16, %c0_17] : memref<1x1x256xf32, #tpu.memory_space<vmem>>, vector<1x1x256xf32>
    tpu.vector_store %arg6[%c0_15, %c0_16, %c0_17], %19 {strides = array<i32>} : memref<1x1x256xf32, #tpu.memory_space<vmem>>, vector<1x1x256xf32>,
    return
  }
  func.func @transform_0(%arg0: i32, %arg1: i32) -> (i32, i32, i32) {
    %c0_i32 = arith.constant 0 : i32
    %c0_i32_0 = arith.constant 0 : i32
    return %arg0, %c0_i32, %arg1 : i32, i32, i32
  }
  func.func @transform_1(%arg0: i32, %arg1: i32) -> (i32, i32) {
    %c0_i32 = arith.constant 0 : i32
    %c0_i32_0 = arith.constant 0 : i32
    %c0_i32_1 = arith.constant 0 : i32
    return %c0_i32, %c0_i32_0 : i32, i32
  }
  func.func @transform_2(%arg0: i32, %arg1: i32) -> (i32, i32) {
    %c0_i32 = arith.constant 0 : i32
    %c0_i32_0 = arith.constant 0 : i32
    %c0_i32_1 = arith.constant 0 : i32
    return %c0_i32, %c0_i32_0 : i32, i32
  }
  func.func @transform_3(%arg0: i32, %arg1: i32) -> (i32, i32) {
    %c0_i32 = arith.constant 0 : i32
    %c0_i32_0 = arith.constant 0 : i32
    %c0_i32_1 = arith.constant 0 : i32
    return %c0_i32, %c0_i32_0 : i32, i32
  }
  func.func @transform_4(%arg0: i32, %arg1: i32) -> (i32, i32, i32) {
    %c0_i32 = arith.constant 0 : i32
    %c0_i32_0 = arith.constant 0 : i32
    return %arg0, %c0_i32, %arg1 : i32, i32, i32
  }
  func.func @transform_5(%arg0: i32, %arg1: i32) -> (i32, i32, i32, i32) {
    %c0_i32 = arith.constant 0 : i32
    %c0_i32_0 = arith.constant 0 : i32
    %c0_i32_1 = arith.constant 0 : i32
    return %arg0, %arg1, %c0_i32, %c0_i32_0 : i32, i32, i32, i32
  }
}

</mosaic_0001>

<bundles_post_ra>
// kernel: tpu_custom_call.1
= control target key start
LH: loop header
LB: loop body
LE: loop exit
PB: predicated region body
PF: predicated region fallthrough
CT: control target
= control target key end

     0   :  { %11 = vsyncpa [#allocation3], 0  ;;  %s1077_s0 = inlined_call_operand.hbm [shape: f32[2,32,256], index: 0, kind: input, shape index: {}]   ;;  %s1078_s1 = inlined_call_operand.vmem [shape: bf16[8,32], index: 1, kind: input, shape index: {}]   ;;  %s1079_s2 = inlined_call_operand.vmem [shape: f32[8,1], index: 2, kind: input, shape index: {}]   ;;  %s1080_s3 = inlined_call_operand.vmem [shape: f32[8,1], index: 3, kind: input, shape index: {}]   ;;  %s1081_s4 = inlined_call_operand.hbm [shape: f32[2,1,256], index: 4, kind: output, shape index: {0}]   ;;  %s1082_s5 = inlined_call_operand.hbm [shape: f32[2,1,1,32], index: 5, kind: output, shape index: {1}]  }
   0x1   :  { %13 = vsyncpa [#allocation3 + $0x1], 0 }
   0x2   :  { %14 = vsyncpa [#allocation4], 0 }
   0x3   :  { %16 = vsyncpa [#allocation4 + $0x1], 0 }
   0x4   :  { %17 = vsyncpa [#allocation7], 0 }
   0x5   :  { %19 = vsyncpa [#allocation7 + $0x1], 0  ;;  %s853_s18 = smov 0   ;;  %s855_s19 = smov 0  }
   0x6   :  { %s857_s20 = smov 0   ;;  %s859_s21 = smov 0  }
   0x7   :  { %s861_s22 = smov 0   ;;  %s863_s23 = smov 0  }
   0x8 LB: > { %s579_s24 = sadd.s32 4294967295, %s814_s23   ;;  %s580_s25 = sadd.s32 4294967294, %s814_s23   ;;  %s814_s23 = sphi %s863_s23, %s25_s23   ;;  %s810_s22 = sphi %s861_s22, %s1097_s22   ;;  %s806_s21 = sphi %s859_s21, %s1096_s21   ;;  %s802_s20 = sphi %s857_s20, %s1095_s20   ;;  %s798_s19 = sphi %s855_s19, %s1094_s19   ;;  %s794_s18 = sphi %s853_s18, %s1093_s18  }
   0x9   : > { %s37_s26 = sadd.s32 1, %s810_s22  ;;  %s46_s27 = sadd.s32 1, %s802_s20 }
   0xa   : > { %p39_p0 = scmp.ge.s32.totalorder %s37_s26, 2  ;;  %p53_p1 = scmp.ne.s32.totalorder %s802_s20, %s798_s19 }
   0xb   : > { %p54_p2 = scmp.eq.s32.totalorder %s814_s23, 0  ;;  %p59_p3 = scmp.ne.s32.totalorder %s798_s19, %s794_s18 }
   0xc   : > { %s1099_s26 = smov (%p39_p0, %s37_s26), 0  ;;  %p60_p5 = scmp.eq.s32.totalorder %s579_s24, 0 }
   0xd   : > { %p894_p4 = por %p54_p2, %p53_p1  ;;  %s41_s29 = ssub.s32 %s810_s22, %s1099_s26 }
   0xe   : > { %p148_p6 = scmp.eq.s32.totalorder %s579_s24, 1  ;;  %p44_p7 = scmp.eq.s32.totalorder %s41_s29, 0 }
   0xf   : > { %p900_p8 = por %p60_p5, %p59_p3  ;;  %p154_p10 = scmp.eq.s32.totalorder %s580_s25, 1 }
  0x10   : > { %p904_p9 = por %p148_p6, %p53_p1  ;;  %p615_p13 = scmp.lt.s32.totalorder %s814_s23, 2 }
  0x11   : > { %s909_s7 = scalar_select %p44_p7, %s802_s20, %s46_s27  }
  0x12   : > { %s1086_s6 = scalar_select %p904_p9, 1, 0 }
  0x13   : > { %p911_p11 = por %p154_p10, %p59_p3  ;;  %s211_s9 = sand.u32 1, %s802_s20  }
  0x14   : > { %s583_s10 = sshll.u32 %s211_s9, 6  ;;  %s596_s11 = sshll.u32 %s810_s22, 10 }
  0x15   : > { %s1087_s8 = scalar_select %p911_p11, 1, 0 }
  0x16   : > { %s922_s14 = scalar_lea.hbm %s1077_s0, %s596_s11  ;;  %s215_s15 = scalar_lea.vmem [#allocation2], %s583_s10 }
  0x17   : > { %s224_s16 = sshll.u32 %s215_s15, 4  ;;  %p928_p0 = pnand %p615_p13, %p894_p4  ;;  %s924_s16 = int_to_ptr.vmem [resolvable:$true] %s224_s16 }
  0x18   : > { %s933_s24 = scalar_lea.sflag [#allocation3], %s211_s9  ;;  %s670_s25 = scalar_lea.hbm %s922_s14, 1024 }
  0x19   : > { %p671_p2 = scmp.ne.s32.totalorder %s922_s14, %s670_s25  ;;  %p672_p3 = pneg %p928_p0 }
  0x1a   : > { %s675_s28 = scalar_lea.hbm %s1077_s0, 2048  ;;  %p676_p4 = scmp.lt.u32.totalorder %s922_s14, %s1077_s0 }
  0x1b   : > { %p673_p5 = pnand %p672_p3, %p671_p2  ;;  %p677_p7 = scmp.lt.u32.totalorder %s675_s28, %s670_s25 }
  0x1c   : > { %p679_p13 = scmp.lt.u32.totalorder %s670_s25, %s922_s14 }
  0x1d   : > { %p674_p6 = pneg %p673_p5  ;;  %p678_p10 = por %p677_p7, %p676_p4 }
  0x1f   : > { %p680_p12 = por %p679_p13, %p678_p10 }
  0x21   : > { %p681_p1 = pnand %p680_p12, %p674_p6 }
  0x23   : > { %684 = shalt.err (!%p681_p1)
}
  0x24   : > { %s685_s9 = scalar_lea.vmem %s924_s16, 1024  ;;  %s816_s12 = smov [#allocation2]  }
  0x25   : > { %p686_p2 = scmp.ne.s32.totalorder %s924_s16, %s685_s9  ;;  %s690_s13 = sshll.u32 %s816_s12, 4  ;;  %s691_s13 = int_to_ptr.vmem [resolvable:$false] %s690_s13 }
  0x26   : > { %s692_s15 = scalar_lea.vmem %s691_s13, 2048  ;;  %p693_p9 = scmp.lt.s32.totalorder %s924_s16, %s691_s13 }
  0x27   : > { %p688_p5 = pnand %p686_p2, %p672_p3  ;;  %p694_p4 = scmp.lt.s32.totalorder %s692_s15, %s685_s9 }
  0x29   : > { %p689_p11 = pneg %p688_p5  ;;  %p695_p7 = por %p694_p4, %p693_p9 }
  0x2b   : > { %p696_p10 = pnand %p695_p7, %p689_p11 }
  0x2d   : > { %699 = shalt.err (!%p696_p10)
}
  0x2e   : > { %s817_s25 = smov 256   ;;  %s818_s27 = smov 16  }
  0x2f   : > { %607 = dma.hbm_to_vmem [thread:$0]  (!%p928_p0), %s922_s14, 1024, %s924_s16, %s933_s24, %s817_s25, %s817_s25, %s818_s27  }
  0x30   : > { %p232_p12 = scmp.lt.s32.totalorder %s814_s23, 3  ;;  %p1089_p1 = scmp.ge.s32.totalorder %s814_s23, 1 }
  0x32   : > { %p233_p3 = pnand %p1089_p1, %p232_p12 }
  0x33   : > { %s965_s29 = sand.u32 (!%p233_p3), 1, %s798_s19  }
  0x34   : > { %236 = sbr.rel (%p233_p3) target bundleno = 322 (0x142), region = 36  ;;  %s587_s28 = sshll.u32 (!%p233_p3), %s965_s29, 6 }
  0x35   : > { %s239_s10 = scalar_lea.sflag (!%p233_p3), [#allocation3], %s965_s29  ;;  %s242_s11 = scalar_lea.vmem (!%p233_p3), [#allocation2], %s587_s28 }
  0x3b   : > { %781 = dma.done.wait (%p900_p8), %s239_s10, 1024  }
  0x3c   : > { %783 = vsyncadd (%p900_p8), %s239_s10, 4294966272  ;;  %v819_v0 = vmov 0   ;;  %v277_v1 = vld [vmem:[%s242_s11 + $0x8] sm:$0xff]  ;;  %v279_v2 = vld [vmem:[%s242_s11 + $0x18] sm:$0xff]  ;;  %vm341_vm0 = vcmask 261120   ;;  %v300_v20 = vlaneseq  ;;  %vm311_vm1 = vcmask 130112  }
  0x3d   : > { %377 = vmatprep.mubr.bf16.mxu0 %v819_v0  ;;  %669 = vset.pattern.permute.xlu0 %v819_v0  ;;  %v276_v3 = vld [vmem:[%s242_s11] sm:$0xff]  ;;  %v331_v4 = vpack.c.bf16 %v279_v2, %v277_v1  ;;  %v278_v5 = vld [vmem:[%s242_s11 + $0x10] sm:$0xff]  ;;  %v281_v6 = vld [vmem:[%s242_s11 + $0x28] sm:$0xff]  ;;  %vm318_vm2 = vcmask 195712   ;;  %s593_s12 = sshll.u32 %s806_s21, 4  ;;  %s272_s13 = scalar_lea.vmem [#allocation6], %s965_s29 }
  0x3e   : > { %v283_v7 = vld [vmem:[%s242_s11 + $0x38] sm:$0xff]  ;;  %v284_v8 = vadd.f32 %v277_v1, %v276_v3  ;;  %v330_v9 = vpack.c.bf16 %v278_v5, %v276_v3  ;;  %v280_v11 = vld [vmem:[%s242_s11 + $0x20] sm:$0xff]  ;;  %v282_v12 = vld [vmem:[%s242_s11 + $0x30] sm:$0xff]  ;;  %v287_v14 = vadd.f32 %v279_v2, %v278_v5  ;;  %v301_v21 = vand.u32 127, %v300_v20  ;;  %s466_s15 = sshll.u32 %s272_s13, 4  ;;  %s995_s28 = scalar_lea.hbm %s1082_s5, %s593_s12  ;;  %s997_s15 = int_to_ptr.vmem [resolvable:$true] %s466_s15 }
  0x3f   : > { %v333_v10 = vpack.c.bf16 %v283_v7, %v281_v6  ;;  %345 = vmatprep.subr.bf16.mxu0 %v331_v4  ;;  %v335_v13 = vld [vmem:[%s1079_s2] sm:$0xff]  ;;  %v332_v15 = vpack.c.bf16 %v282_v12, %v280_v11  ;;  %v293_v17 = vadd.f32 %v283_v7, %v282_v12  ;;  %v290_v19 = vadd.f32 %v281_v6, %v280_v11  ;;  %s437_s10 = scalar_lea.sflag [#allocation7], %s965_s29  ;;  %s700_s11 = scalar_lea.vmem %s997_s15, 16 }
  0x40   : > { %285 = vadd.xlane.f32.xlu1 %v284_v8  ;;  %346 = vmatpush1.bf16.msra.mxu0 %v330_v9  ;;  %v388_v16 = vld [vmem:[%s1080_s3] sm:$0xff]  ;;  %v984_v23 = vshrl.u32 %v300_v20, 7  ;;  %v306_v24 = vadd.s32 4294967288, %v301_v21  ;;  %v320_v29 = vadd.s32 4294967272, %v301_v21  ;;  %v313_v30 = vadd.s32 4294967280, %v301_v21  ;;  %p701_p8 = scmp.ne.s32.totalorder %s997_s15, %s700_s11  ;;  %p1090_p9 = scmp.ne.s32.totalorder %s1086_s6, 0 }
  0x41   : > { %338 = vperm.xlu0 %669, %v335_v13   ;;  %347 = vmatprep.subr.bf16.mxu0 %v333_v10  ;;  %v334_v18 = vld [vmem:[%s1078_s1] sm:$0xf]  ;;  %vm325_vm3 = vcmask 261312   ;;  %vm328_vm4 = vcmask 253952   ;;  %s820_s14 = smov [#allocation6]  }
  0x42   : > { %v304_v27 = vsub.s32 %v301_v21, %v984_v23  ;;  %v309_v28 = vsub.s32 %v306_v24, %v984_v23  ;;  %v323_v34 = vsub.s32 %v320_v29, %v984_v23  ;;  %v316_v35 = vsub.s32 %v313_v30, %v984_v23  ;;  %p702_p11 = pnand %p701_p8, %p1090_p9  ;;  %s704_s16 = sshll.u32 %s820_s14, 4  ;;  %s705_s16 = int_to_ptr.vmem [resolvable:$false] %s704_s16 }
  0x43   : > { %s706_s30 = scalar_lea.vmem %s705_s16, 32  ;;  %p707_p6 = scmp.lt.s32.totalorder %s997_s15, %s705_s16 }
  0x44   : > { %288 = vadd.xlane.f32.xlu1 %v287_v14  ;;  %348 = vmatpush1.bf16.msra.mxu0 %v332_v15  ;;  %p703_p0 = pneg %p702_p11  ;;  %p708_p13 = scmp.lt.s32.totalorder %s706_s30, %s700_s11 }
  0x45   : > { %391 = vperm.xlu0 %669, %v388_v16  }
  0x46   : > { %p709_p2 = por %p708_p13, %p707_p6 }
  0x47   : > { %589 = vmatmul.mubr.msk.bf16.vlgmr.msra.gmra.mrb[0].mxu0 %vm341_vm0, %v334_v18 }
  0x48   : > { %294 = vadd.xlane.f32.xlu1 %v293_v17  ;;  %p710_p5 = pnand %p709_p2, %p703_p0 }
  0x64   : > { %291 = vadd.xlane.f32.xlu0 %v290_v19 }
  0xc0   : > { %v339_v25 = vpop.permute.xlu0 %338 }
  0xc4   : > { %v392_v31 = vpop.permute.xlu0 %391 }
  0xcd   : > { %v286_v22 = vpop.xlane.xlu1 %285 }
  0xce   : > { %v305_v32 = vrot.slane %v286_v22, %v304_v27 }
  0xd1   : > { %v289_v26 = vpop.xlane.xlu1 %288 }
  0xd2   : > { %v310_v33 = vrot.slane %v289_v26, %v309_v28 }
  0xd4   : > { %v312_v37 = vsel %vm311_vm1, %v310_v33, %v305_v32 }
  0xd5   : > { %v295_v36 = vpop.xlane.xlu1 %294 }
  0xd6   : > { %v324_v39 = vrot.slane %v295_v36, %v323_v34 }
  0xf1   : > { %v292_v38 = vpop.xlane.xlu0 %291 }
  0xf2   : > { %v317_v40 = vrot.slane %v292_v38, %v316_v35 }
  0xf4   : > { %v319_v41 = vsel %vm318_vm2, %v317_v40, %v312_v37 }
  0xf5   : > { %v326_v42 = vsel %vm325_vm3, %v324_v39, %v319_v41 }
  0xf6   : > { %329 = vst.msk [vmem:[%s272_s13] sm:$0x1] %vm328_vm4, %v326_v42 }
  0xf7   : > { %713 = shalt.err (!%p710_p5)
}
  0xf8   : > { %s714_s17 = scalar_lea.hbm %s995_s28, 16  ;;  %s718_s12 = scalar_lea.hbm %s1082_s5, 32 }
  0xf9   : > { %p715_p4 = scmp.ne.s32.totalorder %s995_s28, %s714_s17  ;;  %p719_p12 = scmp.lt.u32.totalorder %s995_s28, %s1082_s5 }
  0xfa   : > { %p720_p1 = scmp.lt.u32.totalorder %s718_s12, %s714_s17  ;;  %p722_p8 = scmp.lt.u32.totalorder %s714_s17, %s995_s28 }
  0xfb   : > { %p716_p7 = pnand %p715_p4, %p1090_p9 }
  0xfc   : > { %p721_p3 = por %p720_p1, %p719_p12 }
  0xfd   : > { %p717_p10 = pneg %p716_p7 }
  0xfe   : > { %p723_p11 = por %p722_p8, %p721_p3 }
 0x100   : > { %p724_p0 = pnand %p723_p11, %p717_p10 }
 0x102   : > { %727 = shalt.err (!%p724_p0)
}
 0x103   : > { %601 = dma.vmem_to_hbm [thread:$0]  (%p1090_p9), %s997_s15, 16, %s995_s28, %s437_s10   ;;  %v821_v57 = vmov 1966171168   ;;  %vm428_vm5 = vcmp.lt.s32.totalorder %v300_v20, 256 }
 0x104   : > { %v412_v58 = vunpack.c.l.s4 %v821_v57  ;;  %s588_s15 = sshll.u32 %s965_s29, 1  ;;  %s597_s27 = sshll.u32 %s806_s21, 5 }
 0x105   : > { %s266_s28 = scalar_lea.vmem [#allocation5], %s588_s15  ;;  %s1028_s16 = scalar_lea.hbm %s1081_s4, %s597_s27 }
 0x106   : > { %v413_v63 = vunpack.c.0.s8 %v412_v58  ;;  %s452_s10 = sshll.u32 %s266_s28, 4  ;;  %s432_s30 = scalar_lea.sflag [#allocation4], %s965_s29  ;;  %s1030_s10 = int_to_ptr.vmem [resolvable:$true] %s452_s10 }
 0x107   : > { %s728_s17 = scalar_lea.vmem %s1030_s10, 32  ;;  %s822_s21 = smov [#allocation5]  }
 0x108   : > { %v416_v4 = vsub.s32 %v413_v63, %v984_v23  ;;  %p729_p6 = scmp.ne.s32.totalorder %s1030_s10, %s728_s17  ;;  %s732_s24 = sshll.u32 %s822_s21, 4  ;;  %s733_s24 = int_to_ptr.vmem [resolvable:$false] %s732_s24 }
 0x109   : > { %s734_s9 = scalar_lea.vmem %s733_s24, 64  ;;  %p735_p5 = scmp.lt.s32.totalorder %s1030_s10, %s733_s24 }
 0x10a   : > { %p730_p13 = pnand %p729_p6, %p1090_p9  ;;  %p736_p4 = scmp.lt.s32.totalorder %s734_s9, %s728_s17 }
 0x10c   : > { %p731_p2 = pneg %p730_p13  ;;  %p737_p7 = por %p736_p4, %p735_p5 }
 0x10e   : > { %p738_p10 = pnand %p737_p7, %p731_p2 }
 0x11a   : > { %v379_v43 = vpop.f32.mrb[0].mxu0 }
 0x11b   : > { %v380_v44 = vadd.f32 %v379_v43, %v339_v25  ;;  %v381_v45 = vpop.f32.mrb[1].mxu0 }
 0x11c   : > { %v382_v46 = vadd.f32 %v381_v45, %v339_v25  ;;  %v383_v47 = vpop.f32.mrb[2].mxu0 }
 0x11d   : > { %v386_v48 = vmax.f32 %v380_v44, 0.0  ;;  %v384_v49 = vpop.f32.mrb[3].mxu0 }
 0x11e   : > { %v387_v50 = vmax.f32 %v382_v46, 0.0 }
 0x11f   : > { %v394_v51 = vmul.f32 %v392_v31, %v386_v48 }
 0x120   : > { %v395_v52 = vmul.f32 %v392_v31, %v387_v50 }
 0x121   : > { %v396_v53 = vrot.slane %v394_v51, 4 }
 0x122   : > { %v402_v54 = vrot.slane %v395_v52, 4 }
 0x123   : > { %v397_v55 = vadd.f32 %v396_v53, %v394_v51 }
 0x124   : > { %v403_v56 = vadd.f32 %v402_v54, %v395_v52 }
 0x125   : > { %v398_v59 = vrot.slane %v397_v55, 2 }
 0x126   : > { %v404_v60 = vrot.slane %v403_v56, 2 }
 0x127   : > { %v399_v61 = vadd.f32 %v398_v59, %v397_v55 }
 0x128   : > { %v405_v62 = vadd.f32 %v404_v60, %v403_v56 }
 0x129   : > { %v400_v0 = vrot.slane %v399_v61, 1 }
 0x12a   : > { %v406_v1 = vrot.slane %v405_v62, 1 }
 0x12b   : > { %v401_v2 = vadd.f32 %v400_v0, %v399_v61 }
 0x12c   : > { %v407_v3 = vadd.f32 %v406_v1, %v405_v62 }
 0x12e   : > { %v410_v5 = vcombine.low %v401_v2, %v407_v3 }
 0x130   : > { %v417_v6 = vrot.slane %v410_v5, %v416_v4 }
 0x132   : > { %v424_v7 = vrot.slane %v417_v6, %v416_v4 }
 0x134   : > { %430 = vst.msk [vmem:[%s266_s28] sm:$0x3] %vm428_vm5, %v424_v7 }
 0x135   : > { %741 = shalt.err (!%p738_p10)
}
 0x136   : > { %s742_s29 = scalar_lea.hbm %s1028_s16, 32  ;;  %s746_s25 = scalar_lea.hbm %s1081_s4, 64 }
 0x137   : > { %p743_p12 = scmp.ne.s32.totalorder %s1028_s16, %s742_s29  ;;  %p747_p8 = scmp.lt.u32.totalorder %s1028_s16, %s1081_s4 }
 0x138   : > { %p748_p11 = scmp.lt.u32.totalorder %s746_s25, %s742_s29  ;;  %p750_p6 = scmp.lt.u32.totalorder %s742_s29, %s1028_s16 }
 0x139   : > { %p744_p1 = pnand %p743_p12, %p1090_p9 }
 0x13a   : > { %p749_p0 = por %p748_p11, %p747_p8 }
 0x13b   : > { %p745_p3 = pneg %p744_p1 }
 0x13c   : > { %p751_p13 = por %p750_p6, %p749_p0 }
 0x13e   : > { %p752_p2 = pnand %p751_p13, %p745_p3 }
 0x140   : > { %755 = shalt.err (!%p752_p2)
}
 0x141   : > { %600 = dma.vmem_to_hbm [thread:$0]  (%p1090_p9), %s1030_s10, 32, %s1028_s16, %s432_s30  }
 0x142 PF: > { %s478_s28 = sand.u32 1, %s794_s18   ;;  %p1091_p5 = scmp.ne.s32.totalorder %s1087_s8, 0 }
 0x143   : > { %p1092_p4 = scmp.ge.s32.totalorder %s814_s23, 2  ;;  %s479_s11 = scalar_lea.sflag [#allocation4], %s478_s28 }
 0x145   : > { %p609_p7 = pnand %p1092_p4, %p1091_p5 }
 0x147   : > { %785 = dma.done.wait (!%p609_p7), %s479_s11, 32  }
 0x148   : > { %787 = vsyncadd (!%p609_p7), %s479_s11, 4294967264  ;;  %s488_s14 = scalar_lea.sflag [#allocation7], %s478_s28 }
 0x149   : > { %789 = dma.done.wait (!%p609_p7), %s488_s14, 16  }
 0x14a   : > { %791 = vsyncadd (!%p609_p7), %s488_s14, 4294967280  ;;  %s25_s23 = sadd.s32 1, %s814_s23   ;;  %s1093_s18 = smov %s798_s19 }
 0x14b   : > { %p22_p10 = scmp.ge.s32.totalorder %s25_s23, 4   ;;  %s1094_s19 = smov %s802_s20 }
 0x14c   : > { %s1095_s20 = smov %s909_s7  ;;  %s1096_s21 = smov %s810_s22 }
 0x14d   : > { %s1097_s22 = smov %s1099_s26  ;;  %24 = sbr.rel (!%p22_p10) target bundleno = 8 (0x8), region = 98 }
 0x154   :  { %492 = vsyncpa [#allocation3], 1 }
 0x155   :  { %494 = vsyncpa [#allocation3 + $0x1], 1 }
 0x156   :  { %495 = vsyncpa [#allocation4], 1 }
 0x157   :  { %497 = vsyncpa [#allocation4 + $0x1], 1 }
 0x158   :  { %498 = vsyncpa [#allocation7], 1 }
 0x159   :  { %500 = vsyncpa [#allocation7 + $0x1], 1 }

</bundles_post_ra>
